<compile_context>
chip_gen: v7x
topology: tpu7x:2x2x1
jax: 0.10.0
libtpu: 0.0.40
codegen_flags: <defaults>
</compile_context>

<pallas_src>
import jax
import jax.numpy as jnp
from jax.experimental import pallas as pl
from jax.experimental.pallas import tpu as pltpu

EPS = 1e-5


def basic_block_kernel(x_ref, w1_ref, g1_ref, b1_ref, w2_ref, g2_ref, b2_ref,
                       sel_ref, selt_ref, out_ref):
    """Fused conv3x3 -> bn -> conv3x3 -> bn -> +residual -> relu.

    x_ref:    (N, H, W*C)      activation, width/channel fused on the lane axis (f32)
    w*_ref:   (3*W*C, W*C)     block-banded weights, kh-major on the K axis (bf16)
    g*/b*:    (1, C)           BatchNorm affine parameters (f32)
    sel_ref:  (C, W*C)         channel -> lane broadcast matrix  [l % C == c]
    selt_ref: (W*C, C)         lane -> channel reduction matrix (transpose of sel)
    out_ref:  (N, H, W*C)      lane-dense output (f32)
    """
    N, H, WC = x_ref.shape
    C = g1_ref.shape[1]
    W = WC // C
    M = N * H
    inv_count = 1.0 / float(N * H * W)

    x2d = x_ref[...].reshape(M, WC)          # f32: conv1 input and the residual

    # Row-in-image index, shared by both convs; rows h==0 / h==H-1 need zeroed halos.
    h_idx = jax.lax.broadcasted_iota(jnp.int32, (M, WC), 0) % H

    def conv_lhs(a2d):
        """(M, WC) f32 -> (M, 3*WC) bf16: [row h-1 | row h | row h+1] per output row.

        Sublane shifts go to the XLU (pltpu.roll); image/batch-boundary rows are
        zeroed with a VPU select. No VMEM scratch, no pad copies.
        """
        up = jnp.where(h_idx == 0, 0.0, pltpu.roll(a2d, 1, axis=0))            # row h-1
        down = jnp.where(h_idx == H - 1, 0.0, pltpu.roll(a2d, M - 1, axis=0))  # row h+1
        return jnp.concatenate([up, a2d, down], axis=1).astype(jnp.bfloat16)

    def folded_bn(acc, g_ref, b_ref):
        """Training-mode BN folded to a per-channel affine applied in the fused
        (w, c) lane layout. `acc` is the f32 MXU accumulator (stats stay f32)."""
        row_sum = jnp.sum(acc, axis=0, keepdims=True)                  # (1, WC)  XLU
        row_sq = jnp.sum(acc * acc, axis=0, keepdims=True)             # (1, WC)
        stats = jnp.dot(jnp.concatenate([row_sum, row_sq], axis=0),
                        selt_ref[...],
                        preferred_element_type=jnp.float32)            # (2, C)
        mean = stats[0:1, :] * inv_count
        var = stats[1:2, :] * inv_count - mean * mean
        scale_c = g_ref[...] * jax.lax.rsqrt(var + EPS)                # (1, C)  EUP
        shift_c = b_ref[...] - mean * scale_c                          # (1, C)
        ss = jnp.dot(jnp.concatenate([scale_c, shift_c], axis=0),
                     sel_ref[...],
                     preferred_element_type=jnp.float32)               # (2, WC)
        return acc * ss[0:1, :] + ss[1:2, :]

    # ---- conv1 + bn1 (single K=3*WC bf16 matmul, f32 accumulation) -------------
    acc1 = jnp.dot(conv_lhs(x2d), w1_ref[...], preferred_element_type=jnp.float32)
    y1 = folded_bn(acc1, g1_ref, b1_ref)     # NOTE: no ReLU here (matches module)

    # ---- conv2 + bn2 ------------------------------------------------------------
    acc2 = jnp.dot(conv_lhs(y1), w2_ref[...], preferred_element_type=jnp.float32)
    y2 = folded_bn(acc2, g2_ref, b2_ref)

    # ---- residual (same input array, f32) + ReLU, single lane-dense store -------
    out_ref[...] = jnp.maximum(y2 + x2d, 0.0).reshape(N, H, WC)


def _banded_weight(w_oihw, W):
    """(Cout, Cin, 3, 3) -> (3*W*Cin, W*Cout) block-banded bf16 matrix.

    Slab kh (kh-major on the K axis) applies the three kw taps (width zero padding
    folded in via band clipping) to one H-shifted row of the fused (W*Cin)-wide
    activation, producing the fused (W*Cout)-wide output row.
    """
    Cout, Cin = w_oihw.shape[0], w_oihw.shape[1]
    w_khkwio = jnp.transpose(w_oihw, (2, 3, 1, 0)).astype(jnp.float32)  # (3,3,Cin,Cout)
    v = jnp.arange(W)[None, :, None]          # input width index
    w_idx = jnp.arange(W)[None, None, :]      # output width index
    kw = jnp.arange(3)[:, None, None]
    shift = (v == w_idx + kw - 1).astype(jnp.float32)                   # (3, W, W)
    banded = jnp.einsum('xvw,kxio->kviwo', shift, w_khkwio)             # (3,W,Cin,W,Cout)
    return banded.reshape(3 * W * Cin, W * Cout).astype(jnp.bfloat16)


def basic_block_forward_nhwc(x_nhwc, w1_oihw, g1, b1, w2_oihw, g2, b2):
    """NHWC in / NHWC out (keep this layout end-to-end when chaining blocks)."""
    N, H, W, Cin = x_nhwc.shape
    Cmid, Cout = w1_oihw.shape[0], w2_oihw.shape[0]
    assert Cin == Cmid == Cout, \
        "residual add with downsample=None requires in_channels == out_channels"
    C = Cout
    WC = W * C
    M = N * H

    x_f = x_nhwc.reshape(N, H, WC).astype(jnp.float32)
    w1b = _banded_weight(w1_oihw, W)    # (3*W*C, W*C) bf16
    w2b = _banded_weight(w2_oihw, W)    # (3*W*C, W*C) bf16

    lane_ch = jnp.arange(WC) % C
    sel = (jnp.arange(C)[:, None] == lane_ch[None, :]).astype(jnp.float32)  # (C, WC)
    selt = jnp.transpose(sel)                                               # (WC, C)

    flops = 2 * (2 * M * (3 * WC) * WC)                      # two K=3*WC conv matmuls
    bytes_accessed = (4 * x_f.size + 2 * (w1b.size + w2b.size)
                      + 4 * (sel.size + selt.size + 4 * C + M * WC))

    vmem = pl.BlockSpec(memory_space=pltpu.MemorySpace.VMEM)
    out_f = pl.pallas_call(
        basic_block_kernel,
        out_shape=jax.ShapeDtypeStruct((N, H, WC), jnp.float32),
        in_specs=[vmem] * 9,
        out_specs=vmem,
        cost_estimate=pl.CostEstimate(flops=flops, transcendentals=2 * C,
                                      bytes_accessed=bytes_accessed),
    )(x_f, w1b,
      g1.reshape(1, C).astype(jnp.float32), b1.reshape(1, C).astype(jnp.float32),
      w2b,
      g2.reshape(1, C).astype(jnp.float32), b2.reshape(1, C).astype(jnp.float32),
      sel, selt)

    return out_f.reshape(N, H, W, Cout)


def basic_block_forward(x_nchw, w1_oihw, g1, b1, w2_oihw, g2, b2):
    """PyTorch-compatible wrapper: NCHW in / NCHW out, (O, I, 3, 3) conv weights."""
    x_nhwc = jnp.transpose(x_nchw, (0, 2, 3, 1)).astype(jnp.float32)
    out_nhwc = basic_block_forward_nhwc(x_nhwc, w1_oihw, g1, b1, w2_oihw, g2, b2)
    return jnp.transpose(out_nhwc, (0, 3, 1, 2))


def basic_block_reference(x_nchw, w1, g1, b1, w2, g2, b2):
    """Pure-JAX f32 reference (lax conv) mirroring the PyTorch forward."""
    def conv(x, w):
        return jax.lax.conv_general_dilated(
            x, w, window_strides=(1, 1), padding=((1, 1), (1, 1)),
            dimension_numbers=("NCHW", "OIHW", "NCHW"))

    def bn(x, g, b):
        m = jnp.mean(x, axis=(0, 2, 3), keepdims=True)
        v = jnp.mean((x - m) ** 2, axis=(0, 2, 3), keepdims=True)
        return ((x - m) / jnp.sqrt(v + EPS)) * g.reshape(1, -1, 1, 1) \
            + b.reshape(1, -1, 1, 1)

    y = bn(conv(x_nchw, w1), g1, b1)
    y = bn(conv(y, w2), g2, b2)
    return jnp.maximum(y + x_nchw, 0.0)


if __name__ == "__main__":
    # in_channels = out_channels = 8, 16x16 spatial -> fused lane width W*C = 128.
    N, C, H, W = 2, 8, 16, 16
    key = jax.random.PRNGKey(0)
    kx, kw1, kw2, kg1, kb1, kg2, kb2 = jax.random.split(key, 7)

    x = jax.random.normal(kx, (N, C, H, W), jnp.float32)
    w1 = jax.random.normal(kw1, (C, C, 3, 3), jnp.float32) * 0.1
    w2 = jax.random.normal(kw2, (C, C, 3, 3), jnp.float32) * 0.1
    g1 = jax.random.uniform(kg1, (C,), jnp.float32, 0.5, 1.5)
    b1 = jax.random.normal(kb1, (C,), jnp.float32) * 0.1
    g2 = jax.random.uniform(kg2, (C,), jnp.float32, 0.5, 1.5)
    b2 = jax.random.normal(kb2, (C,), jnp.float32) * 0.1

    fwd = jax.jit(basic_block_forward)
    out = jax.block_until_ready(fwd(x, w1, g1, b1, w2, g2, b2))

    ref = basic_block_reference(x, w1, g1, b1, w2, g2, b2)
    assert out.shape == (N, C, H, W)
    err = jnp.max(jnp.abs(out - ref))
    # bf16 MXU operands (f32 accumulate / BN / residual) vs f32 reference: ~1e-2.
    assert jnp.allclose(out, ref, atol=3e-2, rtol=3e-2), f"max abs err {err}"

    print("KERNEL_OK")
</pallas_src>

<mosaic_0001>
module attributes {stable_mosaic.version = 11 : i64} {
  func.func @basic_block_kernel(%arg0: memref<2x16x128xf32, #tpu.memory_space<vmem>>, %arg1: memref<384x128xbf16, #tpu.memory_space<vmem>>, %arg2: memref<1x8xf32, #tpu.memory_space<vmem>>, %arg3: memref<1x8xf32, #tpu.memory_space<vmem>>, %arg4: memref<384x128xbf16, #tpu.memory_space<vmem>>, %arg5: memref<1x8xf32, #tpu.memory_space<vmem>>, %arg6: memref<1x8xf32, #tpu.memory_space<vmem>>, %arg7: memref<8x128xf32, #tpu.memory_space<vmem>>, %arg8: memref<128x8xf32, #tpu.memory_space<vmem>>, %arg9: memref<2x16x128xf32, #tpu.memory_space<vmem>>) attributes {dimension_semantics = [], scalar_prefetch = 0 : i64, scratch_operands = 0 : i64, tpu.core_type = #tpu.core_type<tc>} {
    %c0 = arith.constant 0 : index
    %c0_0 = arith.constant 0 : index
    %c0_1 = arith.constant 0 : index
    %0 = vector.load %arg0[%c0, %c0_0, %c0_1] : memref<2x16x128xf32, #tpu.memory_space<vmem>>, vector<2x16x128xf32>
    %1 = vector.shape_cast %0 : vector<2x16x128xf32> to vector<32x128xf32>
    %2 = tpu.iota {dimensions = array<i32: 0>} : vector<32x128xi32>
    %c16_i32 = arith.constant 16 : i32
    %c0_i32 = arith.constant 0 : i32
    %3 = arith.cmpi eq, %c16_i32, %c0_i32 : i32
    %c1_i32 = arith.constant 1 : i32
    %4 = arith.select %3, %c1_i32, %c16_i32 : i32
    %5 = vector.broadcast %4 : i32 to vector<32x128xi32>
    %6 = arith.remsi %2, %5 : vector<32x128xi32>
    %c0_i32_2 = arith.constant 0 : i32
    %7 = vector.broadcast %c0_i32_2 : i32 to vector<32x128xi32>
    %8 = arith.cmpi ne, %6, %7 : vector<32x128xi32>
    %c0_i32_3 = arith.constant 0 : i32
    %9 = vector.broadcast %c0_i32_3 : i32 to vector<32x128xi32>
    %10 = arith.cmpi slt, %6, %9 : vector<32x128xi32>
    %c0_i32_4 = arith.constant 0 : i32
    %11 = arith.cmpi slt, %4, %c0_i32_4 : i32
    %12 = vector.broadcast %11 : i1 to vector<32x128xi1>
    %13 = vector.broadcast %12 : vector<32x128xi1> to vector<32x128xi1>
    %14 = arith.xori %10, %13 : vector<32x128xi1>
    %15 = arith.andi %14, %8 : vector<32x128xi1>
    %16 = vector.broadcast %4 : i32 to vector<32x128xi32>
    %17 = arith.addi %6, %16 : vector<32x128xi32>
    %18 = arith.select %15, %17, %6 : vector<32x128xi1>, vector<32x128xi32>
    %c0_i32_5 = arith.constant 0 : i32
    %19 = vector.broadcast %c0_i32_5 : i32 to vector<32x128xi32>
    %20 = arith.cmpi eq, %18, %19 : vector<32x128xi32>
    %c1_i32_6 = arith.constant 1 : i32
    %21 = tpu.dynamic_rotate %1 by %c1_i32_6 dim 0 : vector<32x128xf32>, i32 -> vector<32x128xf32>
    %cst = arith.constant 0.000000e+00 : f32
    %22 = vector.broadcast %cst : f32 to vector<32x128xf32>
    %23 = arith.select %20, %22, %21 : vector<32x128xi1>, vector<32x128xf32>
    %c15_i32 = arith.constant 15 : i32
    %24 = vector.broadcast %c15_i32 : i32 to vector<32x128xi32>
    %25 = arith.cmpi eq, %18, %24 : vector<32x128xi32>
    %c31_i32 = arith.constant 31 : i32
    %26 = tpu.dynamic_rotate %1 by %c31_i32 dim 0 : vector<32x128xf32>, i32 -> vector<32x128xf32>
    %cst_7 = arith.constant 0.000000e+00 : f32
    %27 = vector.broadcast %cst_7 : f32 to vector<32x128xf32>
    %28 = arith.select %25, %27, %26 : vector<32x128xi1>, vector<32x128xf32>
    %29 = tpu.concatenate %23, %1, %28 in 1 : vector<32x128xf32>, vector<32x128xf32>, vector<32x128xf32> -> vector<32x384xf32>
    %30 = arith.truncf %29 : vector<32x384xf32> to vector<32x384xbf16>
    %c0_8 = arith.constant 0 : index
    %c0_9 = arith.constant 0 : index
    %31 = vector.load %arg1[%c0_8, %c0_9] : memref<384x128xbf16, #tpu.memory_space<vmem>>, vector<384x128xbf16>
    %cst_10 = arith.constant dense<0.000000e+00> : vector<32x128xf32>
    %32 = tpu.matmul %30, %31, %cst_10 {dimension_numbers = #tpu.dot_dimension_numbers<[1], [0], [0], [1], [0, 0, 1, 1], [], []>} : vector<32x384xbf16>, vector<384x128xbf16>, vector<32x128xf32> -> vector<32x128xf32>
    %cst_11 = arith.constant dense<0.000000e+00> : vector<128xf32>
    %33 = vector.multi_reduction <add>, %32, %cst_11 [0] : vector<32x128xf32> to vector<128xf32>
    %34 = vector.shape_cast %33 : vector<128xf32> to vector<1x128xf32>
    %35 = arith.mulf %32, %32 : vector<32x128xf32>
    %cst_12 = arith.constant dense<0.000000e+00> : vector<128xf32>
    %36 = vector.multi_reduction <add>, %35, %cst_12 [0] : vector<32x128xf32> to vector<128xf32>
    %37 = vector.shape_cast %36 : vector<128xf32> to vector<1x128xf32>
    %38 = tpu.concatenate %34, %37 in 0 : vector<1x128xf32>, vector<1x128xf32> -> vector<2x128xf32>
    %c0_13 = arith.constant 0 : index
    %c0_14 = arith.constant 0 : index
    %39 = vector.load %arg8[%c0_13, %c0_14] : memref<128x8xf32, #tpu.memory_space<vmem>>, vector<128x8xf32>
    %cst_15 = arith.constant dense<0.000000e+00> : vector<2x8xf32>
    %40 = tpu.matmul %38, %39, %cst_15 {dimension_numbers = #tpu.dot_dimension_numbers<[1], [0], [0], [1], [0, 0, 1, 1], [], []>} : vector<2x128xf32>, vector<128x8xf32>, vector<2x8xf32> -> vector<2x8xf32>
    %41 = vector.extract_strided_slice %40 {offsets = [0, 0], sizes = [1, 8], strides = [1, 1]} : vector<2x8xf32> to vector<1x8xf32>
    %cst_16 = arith.constant 0.001953125 : f32
    %42 = vector.broadcast %cst_16 : f32 to vector<1x8xf32>
    %43 = arith.mulf %41, %42 : vector<1x8xf32>
    %44 = vector.extract_strided_slice %40 {offsets = [1, 0], sizes = [1, 8], strides = [1, 1]} : vector<2x8xf32> to vector<1x8xf32>
    %cst_17 = arith.constant 0.001953125 : f32
    %45 = vector.broadcast %cst_17 : f32 to vector<1x8xf32>
    %46 = arith.mulf %44, %45 : vector<1x8xf32>
    %47 = arith.mulf %43, %43 : vector<1x8xf32>
    %48 = arith.subf %46, %47 : vector<1x8xf32>
    %c0_18 = arith.constant 0 : index
    %c0_19 = arith.constant 0 : index
    %49 = vector.load %arg2[%c0_18, %c0_19] : memref<1x8xf32, #tpu.memory_space<vmem>>, vector<1x8xf32>
    %cst_20 = arith.constant 9.99999974E-6 : f32
    %50 = vector.broadcast %cst_20 : f32 to vector<1x8xf32>
    %51 = arith.addf %48, %50 : vector<1x8xf32>
    %52 = math.rsqrt %51 : vector<1x8xf32>
    %53 = arith.mulf %49, %52 : vector<1x8xf32>
    %c0_21 = arith.constant 0 : index
    %c0_22 = arith.constant 0 : index
    %54 = vector.load %arg3[%c0_21, %c0_22] : memref<1x8xf32, #tpu.memory_space<vmem>>, vector<1x8xf32>
    %55 = arith.mulf %43, %53 : vector<1x8xf32>
    %56 = arith.subf %54, %55 : vector<1x8xf32>
    %57 = tpu.concatenate %53, %56 in 0 : vector<1x8xf32>, vector<1x8xf32> -> vector<2x8xf32>
    %c0_23 = arith.constant 0 : index
    %c0_24 = arith.constant 0 : index
    %58 = vector.load %arg7[%c0_23, %c0_24] : memref<8x128xf32, #tpu.memory_space<vmem>>, vector<8x128xf32>
    %cst_25 = arith.constant dense<0.000000e+00> : vector<2x128xf32>
    %59 = tpu.matmul %57, %58, %cst_25 {dimension_numbers = #tpu.dot_dimension_numbers<[1], [0], [0], [1], [0, 0, 1, 1], [], []>} : vector<2x8xf32>, vector<8x128xf32>, vector<2x128xf32> -> vector<2x128xf32>
    %60 = vector.extract_strided_slice %59 {offsets = [0, 0], sizes = [1, 128], strides = [1, 1]} : vector<2x128xf32> to vector<1x128xf32>
    %61 = vector.broadcast %60 : vector<1x128xf32> to vector<32x128xf32>
    %62 = arith.mulf %32, %61 : vector<32x128xf32>
    %63 = vector.extract_strided_slice %59 {offsets = [1, 0], sizes = [1, 128], strides = [1, 1]} : vector<2x128xf32> to vector<1x128xf32>
    %64 = vector.broadcast %63 : vector<1x128xf32> to vector<32x128xf32>
    %65 = arith.addf %62, %64 : vector<32x128xf32>
    %c0_i32_26 = arith.constant 0 : i32
    %66 = vector.broadcast %c0_i32_26 : i32 to vector<32x128xi32>
    %67 = arith.cmpi eq, %18, %66 : vector<32x128xi32>
    %c1_i32_27 = arith.constant 1 : i32
    %68 = tpu.dynamic_rotate %65 by %c1_i32_27 dim 0 : vector<32x128xf32>, i32 -> vector<32x128xf32>
    %cst_28 = arith.constant 0.000000e+00 : f32
    %69 = vector.broadcast %cst_28 : f32 to vector<32x128xf32>
    %70 = arith.select %67, %69, %68 : vector<32x128xi1>, vector<32x128xf32>
    %c15_i32_29 = arith.constant 15 : i32
    %71 = vector.broadcast %c15_i32_29 : i32 to vector<32x128xi32>
    %72 = arith.cmpi eq, %18, %71 : vector<32x128xi32>
    %c31_i32_30 = arith.constant 31 : i32
    %73 = tpu.dynamic_rotate %65 by %c31_i32_30 dim 0 : vector<32x128xf32>, i32 -> vector<32x128xf32>
    %cst_31 = arith.constant 0.000000e+00 : f32
    %74 = vector.broadcast %cst_31 : f32 to vector<32x128xf32>
    %75 = arith.select %72, %74, %73 : vector<32x128xi1>, vector<32x128xf32>
    %76 = tpu.concatenate %70, %65, %75 in 1 : vector<32x128xf32>, vector<32x128xf32>, vector<32x128xf32> -> vector<32x384xf32>
    %77 = arith.truncf %76 : vector<32x384xf32> to vector<32x384xbf16>
    %c0_32 = arith.constant 0 : index
    %c0_33 = arith.constant 0 : index
    %78 = vector.load %arg4[%c0_32, %c0_33] : memref<384x128xbf16, #tpu.memory_space<vmem>>, vector<384x128xbf16>
    %cst_34 = arith.constant dense<0.000000e+00> : vector<32x128xf32>
    %79 = tpu.matmul %77, %78, %cst_34 {dimension_numbers = #tpu.dot_dimension_numbers<[1], [0], [0], [1], [0, 0, 1, 1], [], []>} : vector<32x384xbf16>, vector<384x128xbf16>, vector<32x128xf32> -> vector<32x128xf32>
    %cst_35 = arith.constant dense<0.000000e+00> : vector<128xf32>
    %80 = vector.multi_reduction <add>, %79, %cst_35 [0] : vector<32x128xf32> to vector<128xf32>
    %81 = vector.shape_cast %80 : vector<128xf32> to vector<1x128xf32>
    %82 = arith.mulf %79, %79 : vector<32x128xf32>
    %cst_36 = arith.constant dense<0.000000e+00> : vector<128xf32>
    %83 = vector.multi_reduction <add>, %82, %cst_36 [0] : vector<32x128xf32> to vector<128xf32>
    %84 = vector.shape_cast %83 : vector<128xf32> to vector<1x128xf32>
    %85 = tpu.concatenate %81, %84 in 0 : vector<1x128xf32>, vector<1x128xf32> -> vector<2x128xf32>
    %c0_37 = arith.constant 0 : index
    %c0_38 = arith.constant 0 : index
    %86 = vector.load %arg8[%c0_37, %c0_38] : memref<128x8xf32, #tpu.memory_space<vmem>>, vector<128x8xf32>
    %cst_39 = arith.constant dense<0.000000e+00> : vector<2x8xf32>
    %87 = tpu.matmul %85, %86, %cst_39 {dimension_numbers = #tpu.dot_dimension_numbers<[1], [0], [0], [1], [0, 0, 1, 1], [], []>} : vector<2x128xf32>, vector<128x8xf32>, vector<2x8xf32> -> vector<2x8xf32>
    %88 = vector.extract_strided_slice %87 {offsets = [0, 0], sizes = [1, 8], strides = [1, 1]} : vector<2x8xf32> to vector<1x8xf32>
    %cst_40 = arith.constant 0.001953125 : f32
    %89 = vector.broadcast %cst_40 : f32 to vector<1x8xf32>
    %90 = arith.mulf %88, %89 : vector<1x8xf32>
    %91 = vector.extract_strided_slice %87 {offsets = [1, 0], sizes = [1, 8], strides = [1, 1]} : vector<2x8xf32> to vector<1x8xf32>
    %cst_41 = arith.constant 0.001953125 : f32
    %92 = vector.broadcast %cst_41 : f32 to vector<1x8xf32>
    %93 = arith.mulf %91, %92 : vector<1x8xf32>
    %94 = arith.mulf %90, %90 : vector<1x8xf32>
    %95 = arith.subf %93, %94 : vector<1x8xf32>
    %c0_42 = arith.constant 0 : index
    %c0_43 = arith.constant 0 : index
    %96 = vector.load %arg5[%c0_42, %c0_43] : memref<1x8xf32, #tpu.memory_space<vmem>>, vector<1x8xf32>
    %cst_44 = arith.constant 9.99999974E-6 : f32
    %97 = vector.broadcast %cst_44 : f32 to vector<1x8xf32>
    %98 = arith.addf %95, %97 : vector<1x8xf32>
    %99 = math.rsqrt %98 : vector<1x8xf32>
    %100 = arith.mulf %96, %99 : vector<1x8xf32>
    %c0_45 = arith.constant 0 : index
    %c0_46 = arith.constant 0 : index
    %101 = vector.load %arg6[%c0_45, %c0_46] : memref<1x8xf32, #tpu.memory_space<vmem>>, vector<1x8xf32>
    %102 = arith.mulf %90, %100 : vector<1x8xf32>
    %103 = arith.subf %101, %102 : vector<1x8xf32>
    %104 = tpu.concatenate %100, %103 in 0 : vector<1x8xf32>, vector<1x8xf32> -> vector<2x8xf32>
    %c0_47 = arith.constant 0 : index
    %c0_48 = arith.constant 0 : index
    %105 = vector.load %arg7[%c0_47, %c0_48] : memref<8x128xf32, #tpu.memory_space<vmem>>, vector<8x128xf32>
    %cst_49 = arith.constant dense<0.000000e+00> : vector<2x128xf32>
    %106 = tpu.matmul %104, %105, %cst_49 {dimension_numbers = #tpu.dot_dimension_numbers<[1], [0], [0], [1], [0, 0, 1, 1], [], []>} : vector<2x8xf32>, vector<8x128xf32>, vector<2x128xf32> -> vector<2x128xf32>
    %107 = vector.extract_strided_slice %106 {offsets = [0, 0], sizes = [1, 128], strides = [1, 1]} : vector<2x128xf32> to vector<1x128xf32>
    %108 = vector.broadcast %107 : vector<1x128xf32> to vector<32x128xf32>
    %109 = arith.mulf %79, %108 : vector<32x128xf32>
    %110 = vector.extract_strided_slice %106 {offsets = [1, 0], sizes = [1, 128], strides = [1, 1]} : vector<2x128xf32> to vector<1x128xf32>
    %111 = vector.broadcast %110 : vector<1x128xf32> to vector<32x128xf32>
    %112 = arith.addf %109, %111 : vector<32x128xf32>
    %113 = arith.addf %112, %1 : vector<32x128xf32>
    %cst_50 = arith.constant 0.000000e+00 : f32
    %114 = vector.broadcast %cst_50 : f32 to vector<32x128xf32>
    %115 = arith.maximumf %113, %114 : vector<32x128xf32>
    %116 = vector.shape_cast %115 : vector<32x128xf32> to vector<2x16x128xf32>
    %c0_51 = arith.constant 0 : index
    %c0_52 = arith.constant 0 : index
    %c0_53 = arith.constant 0 : index
    %117 = vector.load %arg9[%c0_51, %c0_52, %c0_53] : memref<2x16x128xf32, #tpu.memory_space<vmem>>, vector<2x16x128xf32>
    tpu.vector_store %arg9[%c0_51, %c0_52, %c0_53], %116 {strides = array<i32>} : memref<2x16x128xf32, #tpu.memory_space<vmem>>, vector<2x16x128xf32>,
    return
  }
}

</mosaic_0001>

<bundles_post_ra>
// kernel: basic_block_forward.1
= control target key start
LH: loop header
LB: loop body
LE: loop exit
PB: predicated region body
PF: predicated region fallthrough
CT: control target
= control target key end

     0   :  { %v37_v8 = vlaneseq  ;;  %vm1638_vm4 = vmmov 1   ;;  %vm1640_vm11 = vmmov 0   ;;  %vm442_vm12 = vcmask 1040384   ;;  %s2147_s1 = inlined_call_operand.vmem [shape: bf16[384,128], index: 1, kind: input, shape index: {}]   ;;  %s2148_s0 = inlined_call_operand.vmem [shape: f32[2,16,128], index: 0, kind: input, shape index: {}]   ;;  %s2149_s8 = inlined_call_operand.vmem [shape: f32[128,8], index: 8, kind: input, shape index: {}]   ;;  %s2150_s7 = inlined_call_operand.vmem [shape: f32[8,128], index: 7, kind: input, shape index: {}]   ;;  %s2151_s4 = inlined_call_operand.vmem [shape: bf16[384,128], index: 4, kind: input, shape index: {}]   ;;  %s2152_s2 = inlined_call_operand.vmem [shape: f32[1,8], index: 2, kind: input, shape index: {}]   ;;  %s2153_s3 = inlined_call_operand.vmem [shape: f32[1,8], index: 3, kind: input, shape index: {}]   ;;  %s2154_s5 = inlined_call_operand.vmem [shape: f32[1,8], index: 5, kind: input, shape index: {}]   ;;  %s2155_s6 = inlined_call_operand.vmem [shape: f32[1,8], index: 6, kind: input, shape index: {}]   ;;  %s2156_s9 = inlined_call_operand.vmem [shape: f32[2,16,128], index: 9, kind: output, shape index: {}]  }
   0x1   :  { %v1586_v0 = vld [vmem:[%s2147_s1 + $0x40] sm:$0xff]   ;;  %v1589_v3 = vld [vmem:[%s2147_s1 + $0x48] sm:$0xff]   ;;  %v1592_v6 = vld [vmem:[%s2147_s1 + $0x50] sm:$0xff]   ;;  %vm568_vm13 = vcmask 64512  }
   0x2   :  { %v1587_v1 = vld [vmem:[%s2147_s1] sm:$0xff]   ;;  %1299 = vmatprep.subr.bf16.mxu0 %v1586_v0  ;;  %v1590_v4 = vld [vmem:[%s2147_s1 + $0x8] sm:$0xff]   ;;  %v1593_v7 = vld [vmem:[%s2147_s1 + $0x10] sm:$0xff]   ;;  %v1729_v13 = vshrl.u32 %v37_v8, 7 }
   0x3   :  { %v1588_v2 = vld [vmem:[%s2147_s1 + $0x80] sm:$0xff]   ;;  %1300 = vmatpush3.bf16.msra.mxu0 %v1587_v1  ;;  %v1591_v5 = vld [vmem:[%s2147_s1 + $0x88] sm:$0xff]   ;;  %v1594_v9 = vld [vmem:[%s2147_s1 + $0x90] sm:$0xff]  }
   0x4   :  { %1413 = vmatprep.subr.bf16.mxu1 %v1588_v2  ;;  %1301 = vmatprep.subr.bf16.mxu0 %v1589_v3  ;;  %v1595_v10 = vld [vmem:[%s2147_s1 + $0x58] sm:$0xff]   ;;  %v1598_v14 = vld [vmem:[%s2147_s1 + $0x60] sm:$0xff]   ;;  %v39_v17 = vadd.s32 8, %v1729_v13  ;;  %v1601_v18 = vld [vmem:[%s2147_s1 + $0x68] sm:$0xff]   ;;  %v41_v23 = vadd.s32 24, %v1729_v13  ;;  %v46_v26 = vand.u32 15, %v1729_v13 }
   0x5   :  { %1414 = vmatpush3.bf16.msra.mxu1 %v1588_v2  ;;  %v1596_v11 = vld [vmem:[%s2147_s1 + $0x18] sm:$0xff]   ;;  %v1600_v15 = vld [vmem:[%s2147_s1 + $0xa0] sm:$0xff]   ;;  %v1603_v19 = vld [vmem:[%s2147_s1 + $0xa8] sm:$0xff]   ;;  %vm98_vm0 = vcmp.lt.s32.totalorder %v1729_v13, 1  ;;  %vm115_vm1 = vcmp.lt.s32.totalorder %v1729_v13, 7  ;;  %v40_v49 = vadd.s32 16, %v1729_v13 }
   0x6   :  { %1415 = vmatprep.subr.bf16.mxu1 %v1591_v5  ;;  %v1597_v12 = vld [vmem:[%s2147_s1 + $0x98] sm:$0xff]   ;;  %v1599_v16 = vld [vmem:[%s2147_s1 + $0x20] sm:$0xff]   ;;  %v1602_v20 = vld [vmem:[%s2147_s1 + $0x28] sm:$0xff]   ;;  %v53_v21 = vand.u32 15, %v39_v17  ;;  %v67_v32 = vand.u32 15, %v41_v23  ;;  %vm1295_vm3 = vcmp.ne.s32.totalorder %v46_v26, 0 }
   0x7   :  { %1302 = vmatpush3.bf16.msra.mxu0 %v1590_v4  ;;  %v1604_v22 = vld [vmem:[%s2147_s1 + $0x70] sm:$0xff]   ;;  %v1607_v27 = vld [vmem:[%s2147_s1 + $0x78] sm:$0xff]   ;;  %v1768_v28 = vld [vmem:[%s2148_s0] sm:$0xff]  ;;  %v60_v58 = vand.u32 15, %v40_v49  ;;  %v1639_v3 = vmov 0.0|0.0  }
   0x8   :  { %1303 = vmatprep.subr.bf16.mxu0 %v1592_v6  ;;  %v1605_v24 = vld [vmem:[%s2147_s1 + $0x30] sm:$0xff]   ;;  %v1773_v29 = vld [vmem:[%s2148_s0 + $0x8] sm:$0xff]  ;;  %v1778_v30 = vld [vmem:[%s2148_s0 + $0x18] sm:$0xff]  ;;  %vm1781_vm2 = vcmp.ne.s32.totalorder %v53_v21, 15  ;;  %v94_v33 = vrot.slane %v1768_v28, 7  ;;  %v111_v39 = vrot.slane %v1768_v28, 1 }
   0x9   :  { %1416 = vmatpush3.bf16.msra.mxu1 %v1591_v5  ;;  %v1606_v25 = vld [vmem:[%s2147_s1 + $0xb0] sm:$0xff]   ;;  %v95_v34 = vrot.slane %v1773_v29, 7  ;;  %v125_v35 = vpack.c.bf16 %v1773_v29, %v1768_v28  ;;  %v97_v36 = vrot.slane %v1778_v30, 7  ;;  %v1609_v38 = vld [vmem:[%s2147_s1 + $0xb8] sm:$0xff]   ;;  %v112_v40 = vrot.slane %v1773_v29, 1  ;;  %vm1816_vm5 = vmpackc.low %vm1781_vm2, %vm1638_vm4 }
   0xa   :  { %1417 = vmatprep.subr.bf16.mxu1 %v1594_v9  ;;  %v1793_v37 = vld [vmem:[%s2148_s0 + $0x10] sm:$0xff]  ;;  %v114_v42 = vrot.slane %v1778_v30, 1  ;;  %v1608_v43 = vld [vmem:[%s2147_s1 + $0x38] sm:$0xff]   ;;  %vm1298_vm6 = vcmp.ne.s32.totalorder %v67_v32, 15  ;;  %vm1826_vm7 = vmpackc.low %vm1638_vm4, %vm1295_vm3  ;;  %vm1296_vm9 = vcmp.ne.s32.totalorder %v60_v58, 0 }
   0xb   :  { %1304 = vmatpush3.bf16.msra.mxu0 %v1593_v7  ;;  %v113_v41 = vrot.slane %v1793_v37, 1  ;;  %354 = vmatprep.mubr.bf16.mxu0 %v125_v35  ;;  %v101_v44 = vsel %vm98_vm0, %v94_v33, %v95_v34  ;;  %v102_v45 = vsel %vm98_vm0, %v97_v36, %v94_v33  ;;  %v118_v47 = vsel %vm115_vm1, %v111_v39, %v112_v40  ;;  %vm1836_vm8 = vmpackc.low %vm1298_vm6, %vm1638_vm4  ;;  %v444_v0 = vld [vmem:[%s2149_s8] sm:$0xff]  ;;  %v445_v1 = vld [vmem:[%s2149_s8 + $0x8] sm:$0xff] }
   0xc   :  { %1305 = vmatprep.subr.bf16.mxu0 %v1595_v10  ;;  %v119_v52 = vsel %vm115_vm1, %v114_v42, %v111_v39  ;;  %v1239_v53 = vpack.c.bf16 %v101_v44, %v102_v45  ;;  %v128_v55 = vpack.c.bf16 %v1778_v30, %v1793_v37  ;;  %v96_v56 = vrot.slane %v1793_v37, 7  ;;  %vm1849_vm10 = vmpackc.low %vm1638_vm4, %vm1296_vm9  ;;  %v446_v4 = vld [vmem:[%s2149_s8 + $0x10] sm:$0xff]  ;;  %v447_v5 = vld [vmem:[%s2149_s8 + $0x18] sm:$0xff] }
   0xd   :  { %1418 = vmatpush3.bf16.msra.mxu1 %v1594_v9  ;;  %v117_v46 = vsel %vm115_vm1, %v112_v40, %v113_v41  ;;  %v116_v51 = vsel %vm115_vm1, %v113_v41, %v114_v42  ;;  %v1861_v2 = vpack.c.bf16 %v445_v1, %v444_v0  ;;  %v1872_v6 = vpack.c.bf16 %v447_v5, %v446_v4  ;;  %v448_v7 = vld [vmem:[%s2149_s8 + $0x20] sm:$0xff]  ;;  %v449_v8 = vld [vmem:[%s2149_s8 + $0x28] sm:$0xff]  ;;  %v450_v10 = vld [vmem:[%s2149_s8 + $0x30] sm:$0xff] }
   0xe   :  { %1419 = vmatprep.subr.bf16.mxu1 %v1597_v12  ;;  %v1247_v50 = vpack.c.bf16 %v117_v46, %v118_v47  ;;  %v1251_v57 = vpack.c.bf16 %v119_v52, %v116_v51  ;;  %v99_v60 = vsel %vm98_vm0, %v96_v56, %v97_v36  ;;  %v100_v61 = vsel %vm98_vm0, %v95_v34, %v96_v56  ;;  %v454_v17 = vld [vmem:[%s2149_s8 + $0x50] sm:$0xff]  ;;  %v457_v21 = vld [vmem:[%s2149_s8 + $0x68] sm:$0xff] }
   0xf   :  { %1306 = vmatpush3.bf16.msra.mxu0 %v1596_v11  ;;  %v1243_v62 = vpack.c.bf16 %v99_v60, %v100_v61  ;;  %v1882_v9 = vpack.c.bf16 %v449_v8, %v448_v7  ;;  %v451_v11 = vld [vmem:[%s2149_s8 + $0x38] sm:$0xff]  ;;  %v458_v23 = vld [vmem:[%s2149_s8 + $0x70] sm:$0xff] }
  0x10   :  { %1307 = vmatprep.subr.bf16.mxu0 %v1598_v14  ;;  %1429 = vmatprep.mubr.msk.bf16.mxu1 %vm1816_vm5, %v1247_v50  ;;  %v452_v14 = vld [vmem:[%s2149_s8 + $0x40] sm:$0xff] }
  0x11   :  { %1420 = vmatpush3.bf16.msra.mxu1 %v1597_v12  ;;  %v1892_v12 = vpack.c.bf16 %v451_v11, %v450_v10 }
  0x12   :  { %1421 = vmatprep.subr.bf16.mxu1 %v1600_v15 }
  0x13   :  { %1308 = vmatpush3.bf16.msra.mxu0 %v1599_v16 }
  0x14   :  { %1309 = vmatprep.subr.bf16.mxu0 %v1601_v18  ;;  %v455_v18 = vld [vmem:[%s2149_s8 + $0x58] sm:$0xff] }
  0x15   :  { %1422 = vmatpush3.bf16.msra.mxu1 %v1600_v15  ;;  %v453_v15 = vld [vmem:[%s2149_s8 + $0x48] sm:$0xff] }
  0x16   :  { %1423 = vmatprep.subr.bf16.mxu1 %v1603_v19  ;;  %v1902_v16 = vpack.c.bf16 %v453_v15, %v452_v14 }
  0x17   :  { %1310 = vmatpush3.bf16.msra.mxu0 %v1602_v20  ;;  %v456_v20 = vld [vmem:[%s2149_s8 + $0x60] sm:$0xff] }
  0x18   :  { %1311 = vmatprep.subr.bf16.mxu0 %v1604_v22  ;;  %v1922_v22 = vpack.c.bf16 %v457_v21, %v456_v20 }
  0x19   :  { %1424 = vmatpush3.bf16.msra.mxu1 %v1603_v19  ;;  %v1912_v19 = vpack.c.bf16 %v455_v18, %v454_v17 }
  0x1a   :  { %1425 = vmatprep.subr.bf16.mxu1 %v1606_v25 }
  0x1b   :  { %1312 = vmatpush3.bf16.msra.mxu0 %v1605_v24  ;;  %v459_v24 = vld [vmem:[%s2149_s8 + $0x78] sm:$0xff] }
  0x1c   :  { %1313 = vmatprep.subr.bf16.mxu0 %v1607_v27  ;;  %v1934_v26 = vpack.c.bf16 %v459_v24, %v458_v23  ;;  %v1964_v23 = vld [vmem:[%s2150_s7] sm:$0xff] }
  0x1d   :  { %1426 = vmatpush3.bf16.msra.mxu1 %v1606_v25  ;;  %v1641_v25 = vmov 0.0   ;;  %v1610_v24 = vld [vmem:[%s2151_s4 + $0x40] sm:$0xff]  }
  0x1e   :  { %1427 = vmatprep.subr.bf16.mxu1 %v1609_v38 }
  0x1f   :  { %1314 = vmatpush3.bf16.msra.mxu0 %v1608_v43 }
  0x20   :  { %1533 = vmatprep.subr.bf16.mxu0 %v1639_v3 }
  0x21   :  { %1428 = vmatpush3.bf16.msra.mxu1 %v1609_v38 }
  0x22   :  { %1240 = vmatmul.mubr.msk.bf16.vlgmr.msra.gmra.mrb[0].mxu0 %vm1826_vm7, %v1239_v53  ;;  %1468 = vmatprep.subr.mxu1 %v1641_v25 }
  0x23   :  { %362 = vmatprep.mubr.bf16.mxu0 %v128_v55  ;;  %1535 = vmatpush3.bf16.msra.mxu0 %v1861_v2 }
  0x24   :  { %1430 = vmatmul.mubr.msk.bf16.vlgmr.msra.gmra.mrb[0].mxu1 %vm1836_vm8, %v1251_v57  ;;  %1536 = vmatprep.subr.bf16.mxu0 %v1639_v3 }
  0x25   :  { %1470 = vmatprep.mubr.msk.f32.mxu1 %vm1640_vm11, %v1641_v25  ;;  %1469 = vmatpush3.msra.mxu1 %v1964_v23 }
  0x26   :  { %1356 = vmatprep.subr.bf16.mxu1 %v1610_v24  ;;  %v1627_v24 = vld [vmem:[%s2151_s4 + $0xa8] sm:$0xff]  }
  0x27   :  { %1538 = vmatpush3.bf16.msra.mxu0 %v1872_v6 }
  0x28   :  { %1539 = vmatprep.subr.bf16.mxu0 %v1639_v3 }
  0x2a   :  { %1244 = vmatmul.mubr.msk.bf16.gmra.mrb[4].mxu0 %vm1849_vm10, %v1243_v62 }
  0x2b   :  { %1541 = vmatpush3.bf16.msra.mxu0 %v1882_v9  ;;  %1465 = vmatprep.mubr.msk.f32.mxu0 %vm1640_vm11, %v1641_v25 }
  0x2c   :  { %1542 = vmatprep.subr.bf16.mxu0 %v1639_v3 }
  0x2f   :  { %1544 = vmatpush3.bf16.msra.mxu0 %v1892_v12 }
  0x30   :  { %1545 = vmatprep.subr.bf16.mxu0 %v1639_v3 }
  0x33   :  { %1547 = vmatpush3.bf16.msra.mxu0 %v1902_v16 }
  0x34   :  { %1548 = vmatprep.subr.bf16.mxu0 %v1639_v3 }
  0x37   :  { %1550 = vmatpush3.bf16.msra.mxu0 %v1912_v19 }
  0x38   :  { %1551 = vmatprep.subr.bf16.mxu0 %v1639_v3 }
  0x3b   :  { %1553 = vmatpush3.bf16.msra.mxu0 %v1922_v22 }
  0x3c   :  { %1554 = vmatprep.subr.bf16.mxu0 %v1639_v3 }
  0x3f   :  { %1556 = vmatpush3.bf16.msra.mxu0 %v1934_v26 }
  0xf5   :  { %v1315_v27 = vpop.f32.mrb[0].mxu0 }
  0xf6   :  { %v1316_v31 = vpop.f32.mrb[1].mxu0 }
  0xf7   :  { %v1317_v32 = vadd.f32 %v1316_v31, %v1315_v27  ;;  %v1318_v33 = vpop.f32.mrb[2].mxu0  ;;  %v1431_v34 = vpop.f32.mrb[0].mxu1  ;;  %v1612_v27 = vld [vmem:[%s2151_s4 + $0x80] sm:$0xff]   ;;  %v1615_v31 = vld [vmem:[%s2151_s4 + $0x88] sm:$0xff]  }
  0xf8   :  { %v1319_v35 = vpop.f32.mrb[3].mxu0  ;;  %v405_v36 = vpop.f32.mrb[1].mxu1  ;;  %1473 = vmatprep.subr.bf16.mxu0 %v1612_v27 }
  0xf9   :  { %v1320_v38 = vadd.f32 %v1319_v35, %v1318_v33  ;;  %v1940_v39 = vadd.f32 %v1317_v32, %v405_v36  ;;  %v1432_v40 = vpop.f32.mrb[2].mxu1  ;;  %v1618_v32 = vld [vmem:[%s2151_s4 + $0x90] sm:$0xff]   ;;  %v1621_v33 = vld [vmem:[%s2151_s4 + $0x98] sm:$0xff]  }
  0xfa   :  { %v408_v41 = vpop.f32.mrb[3].mxu1 }
  0xfb   :  { %v1942_v42 = vadd.f32 %v1320_v38, %v408_v41  ;;  %v429_v50 = vmul.f32 %v1940_v39, %v1940_v39 }
  0xfd   :  { %v1321_v43 = vpop.f32.mrb[4].mxu0  ;;  %v430_v45 = vmul.f32 %v1942_v42, %v1942_v42  ;;  %v420_v51 = vadd.f32 %v1942_v42, %v1940_v39 }
  0xfe   :  { %v1322_v44 = vpop.f32.mrb[5].mxu0 }
  0xff   :  { %v1323_v46 = vadd.f32 %v1322_v44, %v1321_v43  ;;  %v1324_v47 = vpop.f32.mrb[6].mxu0  ;;  %v433_v55 = vadd.f32 %v430_v45, %v429_v50  ;;  %v1642_v45 = vmov 1966171168  }
 0x100   :  { %v1325_v49 = vpop.f32.mrb[7].mxu0 }
 0x101   :  { %v1950_v52 = vadd.f32 %v1431_v34, %v1323_v46  ;;  %v1326_v53 = vadd.f32 %v1325_v49, %v1324_v47  ;;  %v1624_v34 = vld [vmem:[%s2151_s4 + $0xa0] sm:$0xff]   ;;  %v541_v46 = vunpack.c.l.s4 %v1642_v45 }
 0x103   :  { %v421_v56 = vadd.f32 %v420_v51, %v1950_v52  ;;  %v431_v57 = vmul.f32 %v1950_v52, %v1950_v52  ;;  %v1955_v58 = vadd.f32 %v1432_v40, %v1326_v53  ;;  %v542_v47 = vunpack.c.0.s8 %v541_v46 }
 0x105   :  { %v434_v60 = vadd.f32 %v433_v55, %v431_v57  ;;  %v422_v61 = vadd.f32 %v421_v56, %v1955_v58  ;;  %v432_v62 = vmul.f32 %v1955_v58, %v1955_v58  ;;  %v1986_v49 = vsub.s32 %v542_v47, %v1729_v13  ;;  %v536_v55 = vld [vmem:[%s2152_s2] sm:$0x1] }
 0x107   :  { %v423_v0 = vrot.slane %v422_v61, 4  ;;  %v435_v1 = vadd.f32 %v434_v60, %v432_v62  ;;  %v557_v60 = vld [vmem:[%s2153_s3] sm:$0x1]  ;;  %v1997_v62 = vsub.s32 0, %v1729_v13 }
 0x109   :  { %v424_v4 = vadd.f32 %v423_v0, %v422_v61  ;;  %v436_v5 = vrot.slane %v435_v1, 4 }
 0x10b   :  { %v425_v7 = vrot.slane %v424_v4, 2  ;;  %v437_v8 = vadd.f32 %v436_v5, %v435_v1  ;;  %v1613_v5 = vld [vmem:[%s2151_s4 + $0x48] sm:$0xff]  }
 0x10d   :  { %v426_v10 = vadd.f32 %v425_v7, %v424_v4  ;;  %v438_v11 = vrot.slane %v437_v8, 2  ;;  %v1611_v4 = vld [vmem:[%s2151_s4] sm:$0xff]  }
 0x10f   :  { %v427_v14 = vrot.slane %v426_v10, 1  ;;  %v439_v15 = vadd.f32 %v438_v11, %v437_v8  ;;  %v1614_v8 = vld [vmem:[%s2151_s4 + $0x8] sm:$0xff]   ;;  %v1617_v11 = vld [vmem:[%s2151_s4 + $0x10] sm:$0xff]  }
 0x111   :  { %v440_v17 = vrot.slane %v439_v15, 1  ;;  %v428_v18 = vadd.f32 %v427_v14, %v426_v10  ;;  %v1616_v10 = vld [vmem:[%s2151_s4 + $0x50] sm:$0xff]   ;;  %v1619_v14 = vld [vmem:[%s2151_s4 + $0x58] sm:$0xff]  }
 0x113   :  { %v441_v20 = vadd.f32 %v440_v17, %v439_v15  ;;  %v1620_v15 = vld [vmem:[%s2151_s4 + $0x18] sm:$0xff]   ;;  %v1622_v17 = vld [vmem:[%s2151_s4 + $0x60] sm:$0xff]  }
 0x115   :  { %v443_v21 = vsel %vm442_vm12, %v428_v18, %v441_v20  ;;  %v1623_v18 = vld [vmem:[%s2151_s4 + $0x20] sm:$0xff]   ;;  %v1625_v20 = vld [vmem:[%s2151_s4 + $0x68] sm:$0xff]  }
 0x116   :  { %1466 = vmatmul.mubr.f32.vlgmr.msra.gmra.mrb[8].mxu0 %v443_v21  ;;  %v1626_v21 = vld [vmem:[%s2151_s4 + $0x28] sm:$0xff]  }
 0x117   :  { %1474 = vmatpush3.bf16.msra.mxu0 %v1612_v27  ;;  %v1628_v27 = vld [vmem:[%s2151_s4 + $0x70] sm:$0xff]  }
 0x118   :  { %1475 = vmatprep.subr.bf16.mxu0 %v1615_v31 }
 0x11b   :  { %1476 = vmatpush3.bf16.msra.mxu0 %v1615_v31  ;;  %v1629_v31 = vld [vmem:[%s2151_s4 + $0x30] sm:$0xff]  }
 0x11c   :  { %1477 = vmatprep.subr.bf16.mxu0 %v1618_v32 }
 0x11f   :  { %1478 = vmatpush3.bf16.msra.mxu0 %v1618_v32  ;;  %v1630_v32 = vld [vmem:[%s2151_s4 + $0xb0] sm:$0xff]  }
 0x120   :  { %1479 = vmatprep.subr.bf16.mxu0 %v1621_v33 }
 0x123   :  { %1480 = vmatpush3.bf16.msra.mxu0 %v1621_v33  ;;  %v1631_v33 = vld [vmem:[%s2151_s4 + $0x78] sm:$0xff]  }
 0x124   :  { %1481 = vmatprep.subr.bf16.mxu0 %v1624_v34 }
 0x127   :  { %1482 = vmatpush3.bf16.msra.mxu0 %v1624_v34  ;;  %v1632_v34 = vld [vmem:[%s2151_s4 + $0x38] sm:$0xff]  }
 0x128   :  { %1483 = vmatprep.subr.bf16.mxu0 %v1627_v24 }
 0x12b   :  { %1484 = vmatpush3.bf16.msra.mxu0 %v1627_v24 }
 0x12c   :  { %1485 = vmatprep.subr.bf16.mxu0 %v1630_v32 }
 0x12f   :  { %1486 = vmatpush3.bf16.msra.mxu0 %v1630_v32 }
 0x1e9   :  { %v526_v35 = vpop.f32.mrb[8].mxu0 }
 0x1ea   :  { %v530_v36 = vmul.f32 0.001953125, %v526_v35  ;;  %v1467_v38 = vpop.f32.mrb[9].mxu0  ;;  %v1633_v35 = vld [vmem:[%s2151_s4 + $0xb8] sm:$0xff]  }
 0x1eb   :  { %1487 = vmatprep.subr.bf16.mxu0 %v1633_v35 }
 0x1ec   :  { %v531_v40 = vmul.f32 %v530_v36, %v530_v36  ;;  %1488 = vmatpush3.bf16.msra.mxu0 %v1633_v35 }
 0x1ed   :  { %1528 = vmatprep.subr.mxu0 %v1641_v25 }
 0x1ee   :  { %v533_v41 = vrot.slane %v531_v40, 7 }
 0x1f0   :  { %v535_v43 = vsub.f32 %v530_v36, %v533_v41 }
 0x1f2   :  { %v537_v44 = vadd.f32 1e-05, %v535_v43 }
 0x1f4   :  { %1634 = vrsqrt.f32 %v537_v44 }
 0x1fe   :  { %v1635_v50 = vpop.eup %1634 }
 0x1ff   :  { %v546_v51 = vrot.slane %v1635_v50, %v1986_v49 }
 0x201   :  { %v547_v53 = vcombine.high %v546_v51, %v546_v51 }
 0x203   :  { %v554_v56 = vrot.slane %v547_v53, %v1986_v49 }
 0x205   :  { %v556_v57 = vmul.f32 %v554_v56, %v536_v55 }
 0x207   :  { %v558_v61 = vmul.f32 %v556_v57, %v530_v36  ;;  %v652_v36 = vsub.s32 1, %v1729_v13 }
 0x209   :  { %v559_v0 = vsub.f32 %v557_v60, %v558_v61 }
 0x20b   :  { %v564_v1 = vrot.slane %v559_v0, %v1997_v62 }
 0x20d   :  { %v566_v7 = vsel %vm442_vm12, %v556_v57, %v564_v1 }
 0x20e   :  { %1471 = vmatmul.mubr.msk.f32.vlgmr.msra.gmra.mrb[4].mxu1 %vm568_vm13, %v566_v7 }
 0x20f   :  { %1357 = vmatpush3.bf16.msra.mxu1 %v1611_v4 }
 0x210   :  { %1358 = vmatprep.subr.bf16.mxu1 %v1613_v5 }
 0x213   :  { %1359 = vmatpush3.bf16.msra.mxu1 %v1614_v8 }
 0x214   :  { %1360 = vmatprep.subr.bf16.mxu1 %v1616_v10 }
 0x217   :  { %1361 = vmatpush3.bf16.msra.mxu1 %v1617_v11 }
 0x218   :  { %1362 = vmatprep.subr.bf16.mxu1 %v1619_v14 }
 0x21b   :  { %1363 = vmatpush3.bf16.msra.mxu1 %v1620_v15 }
 0x21c   :  { %1364 = vmatprep.subr.bf16.mxu1 %v1622_v17 }
 0x21f   :  { %1365 = vmatpush3.bf16.msra.mxu1 %v1623_v18 }
 0x220   :  { %1366 = vmatprep.subr.bf16.mxu1 %v1625_v20 }
 0x223   :  { %1367 = vmatpush3.bf16.msra.mxu1 %v1626_v21 }
 0x224   :  { %1368 = vmatprep.subr.bf16.mxu1 %v1628_v27 }
 0x227   :  { %1369 = vmatpush3.bf16.msra.mxu1 %v1629_v31 }
 0x228   :  { %1370 = vmatprep.subr.bf16.mxu1 %v1631_v33 }
 0x22b   :  { %1371 = vmatpush3.bf16.msra.mxu1 %v1632_v34 }
 0x22c   :  { %1557 = vmatprep.subr.bf16.mxu1 %v1639_v3 }
 0x2e1   :  { %v638_v38 = vpop.f32.mrb[4].mxu1 }
 0x2e2   :  { %v645_v40 = vrot.slane %v638_v38, %v1997_v62  ;;  %v1472_v41 = vpop.f32.mrb[5].mxu1  ;;  %v653_v43 = vrot.slane %v638_v38, %v652_v36 }
 0x2e4   :  { %v646_v44 = vmul.f32 %v645_v40, %v1940_v39  ;;  %v647_v45 = vmul.f32 %v645_v40, %v1942_v42  ;;  %v648_v46 = vmul.f32 %v645_v40, %v1950_v52  ;;  %v649_v47 = vmul.f32 %v645_v40, %v1955_v58 }
 0x2e6   :  { %v656_v50 = vadd.f32 %v653_v43, %v648_v46  ;;  %v657_v51 = vadd.f32 %v653_v43, %v649_v47  ;;  %v654_v53 = vadd.f32 %v653_v43, %v646_v44  ;;  %v655_v55 = vadd.f32 %v653_v43, %v647_v45 }
 0x2e8   :  { %v661_v56 = vrot.slane %v657_v51, 7  ;;  %v673_v57 = vrot.slane %v657_v51, 1  ;;  %v658_v60 = vrot.slane %v654_v53, 7  ;;  %v659_v61 = vrot.slane %v655_v55, 7 }
 0x2e9   :  { %v683_v0 = vpack.c.bf16 %v655_v55, %v654_v53  ;;  %v670_v1 = vrot.slane %v654_v53, 1  ;;  %v671_v4 = vrot.slane %v655_v55, 1  ;;  %v672_v5 = vrot.slane %v656_v50, 1 }
 0x2ea   :  { %v664_v39 = vsel %vm98_vm0, %v658_v60, %v659_v61  ;;  %v665_v42 = vsel %vm98_vm0, %v661_v56, %v658_v60  ;;  %v686_v11 = vpack.c.bf16 %v657_v51, %v656_v50  ;;  %v660_v15 = vrot.slane %v656_v50, 7 }
 0x2eb   :  { %912 = vmatprep.mubr.bf16.mxu1 %v683_v0  ;;  %v1280_v52 = vpack.c.bf16 %v664_v39, %v665_v42  ;;  %v675_v58 = vsel %vm115_vm1, %v671_v4, %v672_v5  ;;  %v676_v7 = vsel %vm115_vm1, %v670_v1, %v671_v4  ;;  %v674_v8 = vsel %vm115_vm1, %v672_v5, %v673_v57 }
 0x2ec   :  { %v1288_v10 = vpack.c.bf16 %v675_v58, %v676_v7  ;;  %v677_v14 = vsel %vm115_vm1, %v673_v57, %v670_v1  ;;  %v662_v18 = vsel %vm98_vm0, %v660_v15, %v661_v56  ;;  %v663_v20 = vsel %vm98_vm0, %v659_v61, %v660_v15 }
 0x2ed   :  { %1281 = vmatmul.mubr.msk.bf16.vlgmr.msra.gmra.mrb[8].mxu1 %vm1826_vm7, %v1280_v52  ;;  %v1292_v17 = vpack.c.bf16 %v677_v14, %v674_v8  ;;  %v1284_v48 = vpack.c.bf16 %v662_v18, %v663_v20  ;;  %v1077_v18 = vld [vmem:[%s2154_s5] sm:$0x1] }
 0x2ee   :  { %1489 = vmatprep.mubr.msk.bf16.mxu0 %vm1816_vm5, %v1288_v10  ;;  %920 = vmatprep.mubr.bf16.mxu1 %v686_v11 }
 0x2ef   :  { %1490 = vmatmul.mubr.msk.bf16.vlgmr.msra.gmra.mrb[12].mxu0 %vm1836_vm8, %v1292_v17  ;;  %1559 = vmatpush3.bf16.msra.mxu1 %v1861_v2 }
 0x2f0   :  { %1560 = vmatprep.subr.bf16.mxu1 %v1639_v3  ;;  %1529 = vmatpush3.msra.mxu0 %v1964_v23 }
 0x2f1   :  { %1530 = vmatprep.mubr.msk.f32.mxu0 %vm1640_vm11, %v1641_v25 }
 0x2f3   :  { %1562 = vmatpush3.bf16.msra.mxu1 %v1872_v6 }
 0x2f4   :  { %1563 = vmatprep.subr.bf16.mxu1 %v1639_v3 }
 0x2f5   :  { %1285 = vmatmul.mubr.msk.bf16.gmra.mrb[12].mxu1 %vm1849_vm10, %v1284_v48 }
 0x2f6   :  { %1525 = vmatprep.mubr.msk.f32.mxu1 %vm1640_vm11, %v1641_v25 }
 0x2f7   :  { %1565 = vmatpush3.bf16.msra.mxu1 %v1882_v9 }
 0x2f8   :  { %1566 = vmatprep.subr.bf16.mxu1 %v1639_v3 }
 0x2fb   :  { %1568 = vmatpush3.bf16.msra.mxu1 %v1892_v12 }
 0x2fc   :  { %1569 = vmatprep.subr.bf16.mxu1 %v1639_v3 }
 0x2ff   :  { %1571 = vmatpush3.bf16.msra.mxu1 %v1902_v16 }
 0x300   :  { %1572 = vmatprep.subr.bf16.mxu1 %v1639_v3 }
 0x303   :  { %1574 = vmatpush3.bf16.msra.mxu1 %v1912_v19 }
 0x304   :  { %1575 = vmatprep.subr.bf16.mxu1 %v1639_v3 }
 0x307   :  { %1577 = vmatpush3.bf16.msra.mxu1 %v1922_v22 }
 0x308   :  { %1578 = vmatprep.subr.bf16.mxu1 %v1639_v3 }
 0x30b   :  { %1580 = vmatpush3.bf16.msra.mxu1 %v1934_v26 }
 0x3c0   :  { %v1372_v54 = vpop.f32.mrb[8].mxu1 }
 0x3c1   :  { %v1373_v59 = vpop.f32.mrb[9].mxu1 }
 0x3c2   :  { %v1374_v63 = vadd.f32 %v1373_v59, %v1372_v54  ;;  %v1491_v2 = vpop.f32.mrb[12].mxu0  ;;  %v1375_v6 = vpop.f32.mrb[10].mxu1  ;;  %v1098_v54 = vld [vmem:[%s2155_s6] sm:$0x1] }
 0x3c3   :  { %v963_v9 = vpop.f32.mrb[13].mxu0  ;;  %v1376_v12 = vpop.f32.mrb[11].mxu1 }
 0x3c4   :  { %v2110_v16 = vadd.f32 %v1374_v63, %v963_v9  ;;  %v1377_v25 = vadd.f32 %v1376_v12, %v1375_v6  ;;  %v1492_v23 = vpop.f32.mrb[14].mxu0 }
 0x3c5   :  { %v966_v19 = vpop.f32.mrb[15].mxu0 }
 0x3c6   :  { %v967_v21 = vadd.f32 %v1377_v25, %v966_v19  ;;  %v987_v26 = vmul.f32 %v2110_v16, %v2110_v16 }
 0x3c8   :  { %v1378_v24 = vpop.f32.mrb[12].mxu1  ;;  %v988_v22 = vmul.f32 %v967_v21, %v967_v21  ;;  %v978_v33 = vadd.f32 %v967_v21, %v2110_v16 }
 0x3c9   :  { %v1379_v27 = vpop.f32.mrb[13].mxu1 }
 0x3ca   :  { %v1380_v31 = vadd.f32 %v1379_v27, %v1378_v24  ;;  %v1381_v3 = vpop.f32.mrb[14].mxu1  ;;  %v991_v38 = vadd.f32 %v988_v22, %v987_v26 }
 0x3cb   :  { %v1382_v32 = vpop.f32.mrb[15].mxu1 }
 0x3cc   :  { %v972_v34 = vadd.f32 %v1491_v2, %v1380_v31  ;;  %v1383_v35 = vadd.f32 %v1382_v32, %v1381_v3 }
 0x3ce   :  { %v979_v40 = vadd.f32 %v978_v33, %v972_v34  ;;  %v989_v41 = vmul.f32 %v972_v34, %v972_v34  ;;  %v975_v43 = vadd.f32 %v1492_v23, %v1383_v35 }
 0x3d0   :  { %v992_v44 = vadd.f32 %v991_v38, %v989_v41  ;;  %v980_v45 = vadd.f32 %v979_v40, %v975_v43  ;;  %v990_v46 = vmul.f32 %v975_v43, %v975_v43 }
 0x3d2   :  { %v981_v47 = vrot.slane %v980_v45, 4  ;;  %v993_v50 = vadd.f32 %v992_v44, %v990_v46 }
 0x3d4   :  { %v982_v51 = vadd.f32 %v981_v47, %v980_v45  ;;  %v994_v53 = vrot.slane %v993_v50, 4 }
 0x3d6   :  { %v983_v55 = vrot.slane %v982_v51, 2  ;;  %v995_v56 = vadd.f32 %v994_v53, %v993_v50 }
 0x3d8   :  { %v984_v57 = vadd.f32 %v983_v55, %v982_v51  ;;  %v996_v60 = vrot.slane %v995_v56, 2 }
 0x3da   :  { %v985_v61 = vrot.slane %v984_v57, 1  ;;  %v997_v0 = vadd.f32 %v996_v60, %v995_v56 }
 0x3dc   :  { %v998_v1 = vrot.slane %v997_v0, 1  ;;  %v986_v4 = vadd.f32 %v985_v61, %v984_v57 }
 0x3de   :  { %v999_v5 = vadd.f32 %v998_v1, %v997_v0 }
 0x3e0   :  { %v1000_v39 = vsel %vm442_vm12, %v986_v4, %v999_v5 }
 0x3e1   :  { %1526 = vmatmul.mubr.f32.vlgmr.msra.gmra.mrb[6].mxu1 %v1000_v39 }
 0x4b4   :  { %v1067_v42 = vpop.f32.mrb[6].mxu1 }
 0x4b5   :  { %v1071_v52 = vmul.f32 0.001953125, %v1067_v42  ;;  %v1527_v58 = vpop.f32.mrb[7].mxu1 }
 0x4b7   :  { %v1072_v7 = vmul.f32 %v1071_v52, %v1071_v52 }
 0x4b9   :  { %v1074_v8 = vrot.slane %v1072_v7, 7 }
 0x4bb   :  { %v1076_v10 = vsub.f32 %v1071_v52, %v1074_v8 }
 0x4bd   :  { %v1078_v11 = vadd.f32 1e-05, %v1076_v10 }
 0x4bf   :  { %1636 = vrsqrt.f32 %v1078_v11 }
 0x4c9   :  { %v1637_v14 = vpop.eup %1636 }
 0x4ca   :  { %v1087_v15 = vrot.slane %v1637_v14, %v1986_v49 }
 0x4cc   :  { %v1088_v17 = vcombine.high %v1087_v15, %v1087_v15 }
 0x4ce   :  { %v1095_v20 = vrot.slane %v1088_v17, %v1986_v49 }
 0x4d0   :  { %v1097_v48 = vmul.f32 %v1095_v20, %v1077_v18 }
 0x4d2   :  { %v1099_v59 = vmul.f32 %v1097_v48, %v1071_v52 }
 0x4d4   :  { %v1100_v63 = vsub.f32 %v1098_v54, %v1099_v59 }
 0x4d6   :  { %v1105_v2 = vrot.slane %v1100_v63, %v1997_v62 }
 0x4d8   :  { %v1107_v6 = vsel %vm442_vm12, %v1097_v48, %v1105_v2 }
 0x4d9   :  { %1531 = vmatmul.mubr.msk.f32.vlgmr.msra.gmra.mrb[10].mxu0 %vm568_vm13, %v1107_v6 }
 0x5ac   :  { %v1177_v9 = vpop.f32.mrb[10].mxu0 }
 0x5ad   :  { %v1184_v12 = vrot.slane %v1177_v9, %v1997_v62  ;;  %v1532_v25 = vpop.f32.mrb[11].mxu0  ;;  %v1192_v49 = vrot.slane %v1177_v9, %v652_v36 }
 0x5af   :  { %v1185_v23 = vmul.f32 %v1184_v12, %v2110_v16  ;;  %v1186_v19 = vmul.f32 %v1184_v12, %v967_v21  ;;  %v1187_v24 = vmul.f32 %v1184_v12, %v972_v34  ;;  %v1188_v27 = vmul.f32 %v1184_v12, %v975_v43 }
 0x5b1   :  { %v1193_v22 = vadd.f32 %v1192_v49, %v1185_v23  ;;  %v1194_v31 = vadd.f32 %v1192_v49, %v1186_v19  ;;  %v1195_v3 = vadd.f32 %v1192_v49, %v1187_v24  ;;  %v1196_v32 = vadd.f32 %v1192_v49, %v1188_v27 }
 0x5b3   :  { %v1197_v26 = vadd.f32 %v1193_v22, %v1768_v28  ;;  %v1198_v33 = vadd.f32 %v1194_v31, %v1773_v29  ;;  %v1199_v35 = vadd.f32 %v1195_v3, %v1793_v37  ;;  %v1200_v62 = vadd.f32 %v1196_v32, %v1778_v30 }
 0x5b5   :  { %v1201_v38 = vmax.f32 %v1197_v26, 0.0  ;;  %v1202_v13 = vmax.f32 %v1198_v33, 0.0  ;;  %v1203_v36 = vmax.f32 %v1199_v35, 0.0  ;;  %v1204_v40 = vmax.f32 %v1200_v62, 0.0 }
 0x5b7   :  { %1205 = vst [vmem:[%s2156_s9] sm:$0xff] %v1201_v38  ;;  %1206 = vst [vmem:[%s2156_s9 + $0x8] sm:$0xff] %v1202_v13 }
 0x5b8   :  { %1207 = vst [vmem:[%s2156_s9 + $0x10] sm:$0xff] %v1203_v36  ;;  %1208 = vst [vmem:[%s2156_s9 + $0x18] sm:$0xff] %v1204_v40 }

</bundles_post_ra>
